<compile_context>
chip_gen: v5e
topology: v5e:2x2
jax: 0.10.0
libtpu: 0.0.40
codegen_flags: <defaults>
</compile_context>

<pallas_src>
import functools

import jax
import jax.numpy as jnp
from jax import lax
from jax.experimental import pallas as pl
from jax.experimental.pallas import tpu as pltpu


def get_valid_padding(kernel_size, dilation=1):
    kernel_size = kernel_size + (kernel_size - 1) * (dilation - 1)
    return (kernel_size - 1) // 2


@functools.partial(jax.jit, static_argnames=("kernel_size", "groups"))
def adaptive_fm(x, weight, bias, gamma, *, kernel_size, groups):
    """AdaptiveFM forward: grouped 'same' conv2d(x) * gamma + x.

    x: (N, C, H, W); weight: (C, C//groups, k, k); bias: (C,); gamma: (1,).
    """
    N, C, H, W = x.shape
    k = kernel_size
    p = get_valid_padding(k)
    kk = k * k
    HW = H * W
    NC = N * C
    cpg = C // groups          # input channels per group
    opg = C // groups          # output channels per group (module has C_out == C_in)

    # This module is nn.Conv2d(in, in, k, groups=in//2): C_out == C_in and
    # opg == cpg.  Fail loudly on any other config instead of mis-indexing.
    assert C % groups == 0, "C must be divisible by groups"
    assert weight.shape == (C, cpg, k, k), "expected C_out == C_in grouped conv weight"
    assert bias.shape == (C,) and gamma.shape == (1,)

    K = kk * NC                                   # im2col contraction size
    KPAD = ((K + 127) // 128) * 128               # MXU / lane aligned contraction dim
    pad_rows = KPAD - K

    # ---------------- host-side prep (tiny; jit-fused with the launch) -------
    x2 = x.reshape(NC, HW)                        # free reshape, lane-dense last dim

    # 0/1 masks implementing the conv's zero padding, one (HW,) plane per tap,
    # replicated across the N*C rows -> applied in-kernel with ONE multiply.
    pos = jnp.arange(HW, dtype=jnp.int32)
    row, col = pos // W, pos % W
    mask_rows = []
    for kh in range(k):
        for kw in range(k):
            dh, dw = kh - p, kw - p
            valid = ((row + dh >= 0) & (row + dh < H) &
                     (col + dw >= 0) & (col + dw < W))
            mask_rows.append(valid.astype(jnp.float32))
    masks = jnp.stack(mask_rows, axis=0)                                   # (kk, HW)
    masks_big = jnp.broadcast_to(masks[:, None, :], (kk, NC, HW)).reshape(K, HW)

    # Block-diagonal matmul weights (exact: gather + select only, no dots):
    #   wmat[n*C + o, t*N*C + m*C + i] = weight[o, i - group(o)*cpg, t]
    #                                    if m == n and i in group(o), else 0.
    w_r = weight.reshape(C, cpg, kk).astype(jnp.float32)                   # (o, local, t)
    o_ids = jnp.arange(C)[:, None]                                         # (C, 1)
    i_ids = jnp.arange(C)[None, :]                                         # (1, C)
    same_group = (o_ids // opg) == (i_ids // cpg)                          # (C, C)
    local = jnp.clip(i_ids - (o_ids // opg) * cpg, 0, cpg - 1)             # (C, C)
    gathered = w_r[jnp.broadcast_to(o_ids, (C, C)), local]                 # (C, C, kk)
    wfull = jnp.where(same_group[:, :, None], gathered, 0.0)               # (o, i, t)
    wt = jnp.transpose(wfull, (0, 2, 1))                                   # (o, t, i)
    block = jnp.where(jnp.eye(N, dtype=bool)[:, None, None, :, None],
                      wt[None, :, :, None, :], 0.0)                        # (n,o,t,m,i)
    wmat = jnp.pad(block.reshape(NC, K), ((0, 0), (0, pad_rows)))          # (NC, KPAD)

    bias_col = jnp.tile(bias.astype(jnp.float32), N).reshape(NC, 1)        # row n*C+c -> bias[c]
    gamma_f = gamma.astype(jnp.float32).reshape(1)

    # ---------------- Pallas kernel -------------------------------------------
    def kernel(wmat_ref, bias_ref, gamma_ref, masks_ref, x_ref, out_ref):
        xall = x_ref[...].astype(jnp.float32)                  # (NC, HW): cast once
        # k*k shifted tap planes via XLU rolls over the flattened H*W axis.
        # Wraparound across rows/images only ever lands on masked-out taps.
        planes = []
        for kh in range(k):
            for kw in range(k):
                off = (kh - p) * W + (kw - p)
                planes.append(xall if off == 0
                              else pltpu.roll(xall, shift=(-off) % HW, axis=1))
        # im2col block; conv zero-padding applied with one full-width multiply.
        t_blk = jnp.concatenate(planes, axis=0) * masks_ref[...]           # (K, HW)
        if pad_rows:
            t_blk = jnp.concatenate(
                [t_blk, jnp.zeros((pad_rows, HW), jnp.float32)], axis=0)   # (KPAD, HW)
        # Whole grouped conv (all batches / channels / taps) = one MXU matmul.
        conv = jnp.dot(wmat_ref[...], t_blk,
                       preferred_element_type=jnp.float32,
                       precision=lax.Precision.HIGHEST)                    # (NC, HW)
        out = (conv + bias_ref[...]) * gamma_ref[0] + xall                 # bias, gamma, residual
        out_ref[...] = out.astype(out_ref.dtype)                           # one lane-dense store

    out2 = pl.pallas_call(
        kernel,
        out_shape=jax.ShapeDtypeStruct((NC, HW), x.dtype),
        in_specs=[
            pl.BlockSpec(memory_space=pltpu.MemorySpace.VMEM),   # wmat     (NC, KPAD)
            pl.BlockSpec(memory_space=pltpu.MemorySpace.VMEM),   # bias_col (NC, 1)
            pl.BlockSpec(memory_space=pltpu.MemorySpace.SMEM),   # gamma    (1,)
            pl.BlockSpec(memory_space=pltpu.MemorySpace.VMEM),   # masks    (K, HW)
            pl.BlockSpec(memory_space=pltpu.MemorySpace.VMEM),   # x2       (NC, HW)
        ],
        out_specs=pl.BlockSpec(memory_space=pltpu.MemorySpace.VMEM),
    )(wmat, bias_col, gamma_f, masks_big, x2)

    return out2.reshape(N, C, H, W)


def adaptive_fm_ref(x, weight, bias, gamma, *, kernel_size, groups):
    p = get_valid_padding(kernel_size)
    conv = lax.conv_general_dilated(
        x, weight, window_strides=(1, 1), padding=((p, p), (p, p)),
        dimension_numbers=("NCHW", "OIHW", "NCHW"),
        feature_group_count=groups,
        precision=lax.Precision.HIGHEST)
    conv = conv + bias[None, :, None, None]
    return conv * gamma[0] + x


if __name__ == "__main__":
    # Module config: AdaptiveFM(in_channel=4, kernel_size=3)
    N, C, H, W = 2, 4, 16, 16
    k = 3
    groups = C // 2
    cpg = C // groups

    key = jax.random.PRNGKey(0)
    kx, kw, kb = jax.random.split(key, 3)
    x = jax.random.normal(kx, (N, C, H, W), dtype=jnp.float32)
    fan_in = cpg * k * k
    weight = jax.random.normal(kw, (C, cpg, k, k), dtype=jnp.float32) / jnp.sqrt(fan_in)
    bias = jax.random.normal(kb, (C,), dtype=jnp.float32) * 0.1
    # nn.Parameter(torch.zeros(1)) in __init__; use a nonzero deterministic value
    # so the conv path is actually exercised by the correctness check.
    gamma = jnp.array([0.5], dtype=jnp.float32)

    out = adaptive_fm(x, weight, bias, gamma, kernel_size=k, groups=groups)
    out = jax.block_until_ready(out)

    ref = adaptive_fm_ref(x, weight, bias, gamma, kernel_size=k, groups=groups)
    assert out.shape == (N, C, H, W)
    assert jnp.allclose(out, ref, atol=1e-5, rtol=1e-5), "mismatch vs reference conv"
    print("KERNEL_OK")
</pallas_src>

<mosaic_0001>
module attributes {stable_mosaic.version = 11 : i64} {
  func.func @kernel(%arg0: memref<8x128xf32, #tpu.memory_space<vmem>>, %arg1: memref<8x1xf32, #tpu.memory_space<vmem>>, %arg2: memref<1xf32, #tpu.memory_space<smem>>, %arg3: memref<72x256xf32, #tpu.memory_space<vmem>>, %arg4: memref<8x256xf32, #tpu.memory_space<vmem>>, %arg5: memref<8x256xf32, #tpu.memory_space<vmem>>) attributes {dimension_semantics = [], scalar_prefetch = 0 : i64, scratch_operands = 0 : i64, tpu.core_type = #tpu.core_type<tc>} {
    %c0 = arith.constant 0 : index
    %c0_0 = arith.constant 0 : index
    %0 = vector.load %arg4[%c0, %c0_0] : memref<8x256xf32, #tpu.memory_space<vmem>>, vector<8x256xf32>
    %c17_i32 = arith.constant 17 : i32
    %1 = tpu.dynamic_rotate %0 by %c17_i32 dim 1 : vector<8x256xf32>, i32 -> vector<8x256xf32>
    %c16_i32 = arith.constant 16 : i32
    %2 = tpu.dynamic_rotate %0 by %c16_i32 dim 1 : vector<8x256xf32>, i32 -> vector<8x256xf32>
    %c15_i32 = arith.constant 15 : i32
    %3 = tpu.dynamic_rotate %0 by %c15_i32 dim 1 : vector<8x256xf32>, i32 -> vector<8x256xf32>
    %c1_i32 = arith.constant 1 : i32
    %4 = tpu.dynamic_rotate %0 by %c1_i32 dim 1 : vector<8x256xf32>, i32 -> vector<8x256xf32>
    %c255_i32 = arith.constant 255 : i32
    %5 = tpu.dynamic_rotate %0 by %c255_i32 dim 1 : vector<8x256xf32>, i32 -> vector<8x256xf32>
    %c241_i32 = arith.constant 241 : i32
    %6 = tpu.dynamic_rotate %0 by %c241_i32 dim 1 : vector<8x256xf32>, i32 -> vector<8x256xf32>
    %c240_i32 = arith.constant 240 : i32
    %7 = tpu.dynamic_rotate %0 by %c240_i32 dim 1 : vector<8x256xf32>, i32 -> vector<8x256xf32>
    %c239_i32 = arith.constant 239 : i32
    %8 = tpu.dynamic_rotate %0 by %c239_i32 dim 1 : vector<8x256xf32>, i32 -> vector<8x256xf32>
    %9 = tpu.concatenate %1, %2, %3, %4, %0, %5, %6, %7, %8 in 0 : vector<8x256xf32>, vector<8x256xf32>, vector<8x256xf32>, vector<8x256xf32>, vector<8x256xf32>, vector<8x256xf32>, vector<8x256xf32>, vector<8x256xf32>, vector<8x256xf32> -> vector<72x256xf32>
    %c0_1 = arith.constant 0 : index
    %c0_2 = arith.constant 0 : index
    %10 = vector.load %arg3[%c0_1, %c0_2] : memref<72x256xf32, #tpu.memory_space<vmem>>, vector<72x256xf32>
    %11 = arith.mulf %9, %10 : vector<72x256xf32>
    %cst = arith.constant 0.000000e+00 : f32
    %12 = vector.broadcast %cst : f32 to vector<56x256xf32>
    %13 = tpu.concatenate %11, %12 in 0 : vector<72x256xf32>, vector<56x256xf32> -> vector<128x256xf32>
    %c0_3 = arith.constant 0 : index
    %c0_4 = arith.constant 0 : index
    %14 = vector.load %arg0[%c0_3, %c0_4] : memref<8x128xf32, #tpu.memory_space<vmem>>, vector<8x128xf32>
    %cst_5 = arith.constant dense<0.000000e+00> : vector<8x256xf32>
    %15 = tpu.matmul %14, %13, %cst_5 {dimension_numbers = #tpu.dot_dimension_numbers<[1], [0], [0], [1], [0, 0, 1, 1], [], []>, precision = #tpu.contract_precision<fp32>} : vector<8x128xf32>, vector<128x256xf32>, vector<8x256xf32> -> vector<8x256xf32>
    %c0_6 = arith.constant 0 : index
    %c0_7 = arith.constant 0 : index
    %16 = vector.load %arg1[%c0_6, %c0_7] : memref<8x1xf32, #tpu.memory_space<vmem>>, vector<8x1xf32>
    %17 = vector.broadcast %16 : vector<8x1xf32> to vector<8x256xf32>
    %18 = arith.addf %15, %17 : vector<8x256xf32>
    %c0_8 = arith.constant 0 : index
    %19 = memref.load %arg2[%c0_8] : memref<1xf32, #tpu.memory_space<smem>>
    %20 = vector.broadcast %19 : f32 to vector<8x256xf32>
    %21 = arith.mulf %18, %20 : vector<8x256xf32>
    %22 = arith.addf %21, %0 : vector<8x256xf32>
    %c0_9 = arith.constant 0 : index
    %c0_10 = arith.constant 0 : index
    %23 = vector.load %arg5[%c0_9, %c0_10] : memref<8x256xf32, #tpu.memory_space<vmem>>, vector<8x256xf32>
    tpu.vector_store %arg5[%c0_9, %c0_10], %22 {strides = array<i32>} : memref<8x256xf32, #tpu.memory_space<vmem>>, vector<8x256xf32>,
    return
  }
}

</mosaic_0001>

<bundles_post_ra>
// kernel: tile.8
= control target key start
LH: loop header
LB: loop body
LE: loop exit
PB: predicated region body
PF: predicated region fallthrough
CT: control target
= control target key end

     0   :  { %s22_s0 = inlined_call_operand.vmem [shape: f32[4], index: 0, kind: input, shape index: {}]   ;;  %s23_s1 = inlined_call_operand.vmem [shape: f32[2,4], index: 1, kind: output, shape index: {}]  }
   0x1   :  { %v4_v0 = vld [vmem:[%s22_s0] ss:$0 sm:$0xff] }
   0x2   :  { %5 = vst [vmem:[%s23_s1] sm:$0x3] %v4_v0 }

// kernel: tile.0
= control target key start
LH: loop header
LB: loop body
LE: loop exit
PB: predicated region body
PF: predicated region fallthrough
CT: control target
= control target key end

     0   :  { %s34_s8 = smov 125   ;;  %s35_s9 = smov 126   ;;  %vm7_vm0 = vcmask 7168   ;;  %s61_s0 = inlined_call_operand.vmem [shape: f32[2,4], index: 0, kind: input, shape index: {}]   ;;  %s62_s1 = inlined_call_operand.vmem [shape: f32[8,1], index: 1, kind: output, shape index: {}]  }
   0x1   :  { %v4_v0 = vld [vmem:[%s61_s0] sm:$0x3]  ;;  %s33_s0 = smov 127  }
   0x2   :  { %5 = vst [vmem:[#allocation0] sm:$0x3] %v4_v0 }
   0x9   :  { %v9_v1 = vld [vmem:[#allocation0] sm:$0x3]  }
   0xa   :  { %v21_v2 = vld [vmem:[#allocation0] sm:$0x3]   ;;  %10 = vrot.lane.b32.xlu0 %v9_v1, %s33_s0 }
   0xb   :  { %22 = vrot.lane.b32.xlu1 %v21_v2, %s34_s8  ;;  %v15_v3 = vld [vmem:[#allocation0] sm:$0x3]  }
   0xc   :  { %v6_v4 = vld [vmem:[#allocation0] sm:$0x3]  }
   0xd   :  { %8 = vst.msk [vmem:[%s62_s1] ss:$4 sm:$0x3] %vm7_vm0, %v6_v4  }
  0x12   :  { %16 = vrot.lane.b32.xlu0 %v15_v3, %s35_s9 }
  0x7c   :  { %v11_v5 = vpop.permute.xlu0 %10  }
  0x7d   :  { %v23_v6 = vpop.permute.xlu1 %22   ;;  %27 = vst.msk [vmem:[%s62_s1 + $0x1] ss:$4 sm:$0x3] %vm7_vm0, %v11_v5  }
  0x7e   :  { %29 = vst.msk [vmem:[%s62_s1 + $0x3] ss:$4 sm:$0x3] %vm7_vm0, %v23_v6  }
  0x84   :  { %v17_v7 = vpop.permute.xlu0 %16  }
  0x85   :  { %28 = vst.msk [vmem:[%s62_s1 + $0x2] ss:$4 sm:$0x3] %vm7_vm0, %v17_v7  }

// kernel: adaptive_fm.1
= control target key start
LH: loop header
LB: loop body
LE: loop exit
PB: predicated region body
PF: predicated region fallthrough
CT: control target
= control target key end

     0   :  { %s647_s20 = smov 112   ;;  %s648_s21 = smov 111   ;;  %v27_v3 = vlaneseq  ;;  %s1128_s4 = inlined_call_operand.vmem [shape: f32[8,256], index: 4, kind: input, shape index: {}]   ;;  %s1129_s3 = inlined_call_operand.vmem [shape: f32[72,256], index: 3, kind: input, shape index: {}]   ;;  %s1130_s0 = inlined_call_operand.vmem [shape: f32[8,128], index: 0, kind: input, shape index: {}]   ;;  %s1131_s1 = inlined_call_operand.vmem [shape: f32[8,1], index: 1, kind: input, shape index: {}]   ;;  %s1132_s2 = inlined_call_operand.<no memory space> [shape: f32[1], index: 2, kind: input, shape index: {}]   ;;  %s1133_s5 = inlined_call_operand.vmem [shape: f32[8,256], index: 5, kind: output, shape index: {}]  }
   0x1   :  { %v689_v0 = vld [vmem:[%s1128_s4] sm:$0xff]  ;;  %s649_s22 = smov 113   ;;  %v697_v1 = vld [vmem:[%s1128_s4 + $0x8] sm:$0xff]  ;;  %s650_s25 = smov 127   ;;  %v95_v12 = vld [vmem:[%s1129_s3 + $0x70] sm:$0xff] }
   0x2   :  { %67 = vrot.lane.b32.xlu1 %v689_v0, %s647_s20  ;;  %74 = vrot.lane.b32.xlu0 %v689_v0, %s648_s21  ;;  %s651_s26 = smov 1   ;;  %s652_s27 = smov 15   ;;  %v714_v4 = vand.u32 127, %v27_v3  ;;  %v93_v9 = vld [vmem:[%s1129_s3 + $0x60] sm:$0xff]  ;;  %v91_v28 = vld [vmem:[%s1129_s3 + $0x50] sm:$0xff] }
   0x3   :  { %60 = vrot.lane.b32.xlu2 %v689_v0, %s649_s22  ;;  %s653_s4 = smov 16   ;;  %s654_s28 = smov 17   ;;  %v89_v11 = vld [vmem:[%s1129_s3 + $0x40] sm:$0xff]  ;;  %v98_v45 = vld [vmem:[%s1129_s3 + $0x88] sm:$0xff]  ;;  %v87_v49 = vld [vmem:[%s1129_s3 + $0x30] sm:$0xff] }
   0x4   :  { %vm64_vm0 = vcmp.lt.s32.totalorder %v714_v4, 113  ;;  %vm71_vm1 = vcmp.lt.s32.totalorder %v714_v4, 112  ;;  %vm78_vm2 = vcmp.lt.s32.totalorder %v714_v4, 111  ;;  %v97_v13 = vld [vmem:[%s1129_s3 + $0x80] sm:$0xff]  ;;  %v107_v19 = vmul.f32 %v89_v11, %v689_v0  ;;  %v96_v53 = vld [vmem:[%s1129_s3 + $0x78] sm:$0xff]  ;;  %v94_v58 = vld [vmem:[%s1129_s3 + $0x68] sm:$0xff] }
   0x5   :  { %vm57_vm3 = vcmp.lt.s32.totalorder %v714_v4, 127  ;;  %vm50_vm4 = vcmp.lt.s32.totalorder %v714_v4, 1  ;;  %vm43_vm5 = vcmp.lt.s32.totalorder %v714_v4, 15  ;;  %v85_v50 = vld [vmem:[%s1129_s3 + $0x20] sm:$0xff]  ;;  %vm36_vm6 = vcmp.lt.s32.totalorder %v714_v4, 16 }
   0x6   :  { %v756_v26 = vand.u32 4294901760, %v107_v19  ;;  %vm29_vm7 = vcmp.lt.s32.totalorder %v714_v4, 17 }
   0x8   :  { %v779_v36 = vsub.f32 %v107_v19, %v756_v26 }
   0xa   :  { %69 = vrot.lane.b32.xlu1 %v697_v1, %s647_s20  ;;  %76 = vrot.lane.b32.xlu0 %v697_v1, %s648_s21  ;;  %v191_v43 = vand.u32 4294901760, %v779_v36 }
   0xb   :  { %62 = vrot.lane.b32.xlu2 %v697_v1, %s649_s22 }
   0xc   :  { %v192_v62 = vsub.f32 %v779_v36, %v191_v43 }
  0x12   :  { %55 = vrot.lane.b32.xlu1 %v697_v1, %s650_s25  ;;  %53 = vrot.lane.b32.xlu0 %v689_v0, %s650_s25 }
  0x13   :  { %46 = vrot.lane.b32.xlu2 %v689_v0, %s651_s26 }
  0x1a   :  { %39 = vrot.lane.b32.xlu1 %v689_v0, %s652_s27  ;;  %48 = vrot.lane.b32.xlu0 %v697_v1, %s651_s26 }
  0x1b   :  { %41 = vrot.lane.b32.xlu2 %v697_v1, %s652_s27 }
  0x22   :  { %34 = vrot.lane.b32.xlu1 %v697_v1, %s653_s4  ;;  %32 = vrot.lane.b32.xlu0 %v689_v0, %s653_s4 }
  0x23   :  { %23 = vrot.lane.b32.xlu2 %v689_v0, %s654_s28 }
  0x2a   :  { %25 = vrot.lane.b32.xlu0 %v697_v1, %s654_s28 }
  0x5d   :  { %v712_v2 = vpop.permute.xlu2 %60 }
  0x65   :  { %v717_v5 = vpop.permute.xlu2 %62 }
  0x66   :  { %v65_v8 = vsel %vm64_vm0, %v712_v2, %v717_v5  ;;  %v66_v51 = vsel %vm64_vm0, %v717_v5, %v712_v2 }
  0x67   :  { %v111_v10 = vmul.f32 %v93_v9, %v65_v8  ;;  %v92_v9 = vld [vmem:[%s1129_s3 + $0x58] sm:$0xff] }
  0x69   :  { %v739_v14 = vand.u32 4294901760, %v111_v10 }
  0x6b   :  { %v754_v25 = vsub.f32 %v111_v10, %v739_v14 }
  0x6d   :  { %v751_v24 = vpop.permute.xlu2 %46  ;;  %v179_v33 = vand.u32 4294901760, %v754_v25 }
  0x6f   :  { %v180_v42 = vsub.f32 %v754_v25, %v179_v33 }
  0x71   :  { %v181_v56 = vand.u32 4294901760, %v180_v42  ;;  %v88_v42 = vld [vmem:[%s1129_s3 + $0x38] sm:$0xff] }
  0x74   :  { %v719_v6 = vpop.permute.xlu1 %67  ;;  %v75_v7 = vpop.permute.xlu0 %74 }
  0x75   :  { %v42_v48 = vpop.permute.xlu2 %41 }
  0x7c   :  { %v70_v15 = vpop.permute.xlu1 %69  ;;  %v77_v16 = vpop.permute.xlu0 %76 }
  0x7d   :  { %v72_v17 = vsel %vm71_vm1, %v719_v6, %v70_v15  ;;  %v79_v18 = vsel %vm78_vm2, %v75_v7, %v77_v16  ;;  %v80_v44 = vsel %vm78_vm2, %v77_v16, %v75_v7  ;;  %v73_v52 = vsel %vm71_vm1, %v70_v15, %v719_v6  ;;  %v117_v6 = vld [vmem:[%s1130_s0] sm:$0xff] }
  0x7e   :  { %v113_v20 = vmul.f32 %v95_v12, %v72_v17  ;;  %v115_v21 = vmul.f32 %v97_v13, %v79_v18  ;;  %v116_v59 = vmul.f32 %v98_v45, %v80_v44  ;;  %v114_v3 = vmul.f32 %v96_v53, %v73_v52  ;;  %v90_v12 = vld [vmem:[%s1129_s3 + $0x48] sm:$0xff] }
  0x7f   :  { %v112_v7 = vmul.f32 %v94_v58, %v66_v51  ;;  %v193_v16 = vand.u32 4294901760, %v192_v62  ;;  %v867_v18 = vand.u32 4294901760, %v117_v6  ;;  %v84_v62 = vld [vmem:[%s1129_s3 + $0x18] sm:$0xff] }
  0x80   :  { %v747_v22 = vand.u32 4294901760, %v113_v20  ;;  %v749_v23 = vand.u32 4294901760, %v115_v21  ;;  %v859_v13 = vand.u32 4294901760, %v116_v59  ;;  %v869_v19 = vand.u32 4294901760, %v114_v3 }
  0x81   :  { %v906_v51 = vsub.f32 %v117_v6, %v867_v18 }
  0x82   :  { %132 = vmatpush.msra.mxu0 %v749_v23  ;;  %272 = vmatpush.msra.mxu3 %v749_v23  ;;  %v762_v27 = vsub.f32 %v115_v21, %v749_v23  ;;  %v768_v29 = vsub.f32 %v113_v20, %v747_v22  ;;  %v83_v21 = vld [vmem:[%s1129_s3 + $0x10] sm:$0xff]  ;;  %v909_v52 = vsub.f32 %v114_v3, %v869_v19  ;;  %v24_v3 = vpop.permute.xlu2 %23 }
  0x83   :  { %v935_v6 = vand.u32 4294901760, %v906_v51 }
  0x84   :  { %v56_v30 = vpop.permute.xlu1 %55  ;;  %v54_v31 = vpop.permute.xlu0 %53  ;;  %134 = vmatpush.msra.mxu0 %v747_v22  ;;  %233 = vmatpush.msra.mxu2 %v762_v27  ;;  %v167_v32 = vand.u32 4294901760, %v762_v27  ;;  %v173_v35 = vand.u32 4294901760, %v768_v29 }
  0x85   :  { %v58_v34 = vsel %vm57_vm3, %v54_v31, %v56_v30  ;;  %274 = vmatpush.msra.mxu3 %v747_v22  ;;  %v59_v8 = vsel %vm57_vm3, %v56_v30, %v54_v31  ;;  %v108_v30 = vmul.f32 %v90_v12, %v697_v1  ;;  %v878_v31 = vand.u32 4294901760, %v112_v7 }
  0x86   :  { %v109_v37 = vmul.f32 %v91_v28, %v58_v34  ;;  %136 = vmatpush.msra.mxu0 %v739_v14  ;;  %236 = vmatpush.msra.mxu2 %v768_v29  ;;  %v168_v38 = vsub.f32 %v762_v27, %v167_v32  ;;  %v174_v39 = vsub.f32 %v768_v29, %v173_v35  ;;  %v423_v12 = vand.u32 4294901760, %v909_v52 }
  0x87   :  { %276 = vmatpush.msra.mxu3 %v739_v14  ;;  %v110_v20 = vmul.f32 %v92_v9, %v59_v8  ;;  %v81_v8 = vld [vmem:[%s1129_s3] sm:$0xff]  ;;  %v82_v9 = vld [vmem:[%s1129_s3 + $0x8] sm:$0xff] }
  0x88   :  { %v790_v40 = vand.u32 4294901760, %v109_v37  ;;  %239 = vmatpush.msra.mxu2 %v754_v25  ;;  %v169_v41 = vand.u32 4294901760, %v168_v38  ;;  %v175_v46 = vand.u32 4294901760, %v174_v39  ;;  %v884_v39 = vsub.f32 %v116_v59, %v859_v13 }
  0x89   :  { %v911_v53 = vand.u32 4294901760, %v110_v20 }
  0x8a   :  { %138 = vmatpush.msra.mxu0 %v790_v40  ;;  %170 = vmatpush.msra.mxu1 %v169_v41  ;;  %v805_v47 = vsub.f32 %v109_v37, %v790_v40 }
  0x8b   :  { %278 = vmatpush.msra.mxu3 %v790_v40 }
  0x8c   :  { %v40_v54 = vpop.permute.xlu1 %39  ;;  %v49_v55 = vpop.permute.xlu0 %48  ;;  %176 = vmatpush.msra.mxu1 %v175_v46  ;;  %242 = vmatpush.msra.mxu2 %v805_v47  ;;  %v185_v57 = vand.u32 4294901760, %v805_v47 }
  0x8d   :  { %v52_v60 = vsel %vm50_vm4, %v49_v55, %v751_v24  ;;  %v45_v61 = vsel %vm43_vm5, %v42_v48, %v40_v54  ;;  %140 = vmatpush.msra.mxu0 %v756_v26  ;;  %280 = vmatpush.msra.mxu3 %v756_v26  ;;  %v51_v41 = vsel %vm50_vm4, %v751_v24, %v49_v55 }
  0x8e   :  { %v105_v63 = vmul.f32 %v87_v49, %v52_v60  ;;  %v103_v2 = vmul.f32 %v85_v50, %v45_v61  ;;  %182 = vmatpush.msra.mxu1 %v181_v56  ;;  %v186_v5 = vsub.f32 %v805_v47, %v185_v57  ;;  %245 = vmatpush.msra.mxu2 %v779_v36  ;;  %v86_v49 = vld [vmem:[%s1129_s3 + $0x28] sm:$0xff] }
  0x8f   :  { %v44_v46 = vsel %vm43_vm5, %v40_v54, %v42_v48  ;;  %v916_v54 = vand.u32 4294901760, %v108_v30  ;;  %v919_v55 = vsub.f32 %v112_v7, %v878_v31  ;;  %v106_v56 = vmul.f32 %v88_v42, %v51_v41 }
  0x90   :  { %v852_v10 = vand.u32 4294901760, %v105_v63  ;;  %v854_v11 = vand.u32 4294901760, %v103_v2  ;;  %v187_v15 = vand.u32 4294901760, %v186_v5  ;;  %v104_v60 = vmul.f32 %v86_v49, %v44_v46 }
  0x91   :  { %v938_v7 = vsub.f32 %v110_v20, %v911_v53 }
  0x92   :  { %142 = vmatpush.msra.mxu0 %v852_v10  ;;  %282 = vmatpush.msra.mxu3 %v852_v10  ;;  %v865_v17 = vsub.f32 %v105_v63, %v852_v10  ;;  %v875_v28 = vsub.f32 %v103_v2, %v854_v11  ;;  %v417_v2 = vand.u32 4294901760, %v884_v39  ;;  %v956_v41 = vand.u32 4294901760, %v104_v60 }
  0x93   :  { %188 = vmatpush.msra.mxu1 %v187_v15  ;;  %v949_v15 = vsub.f32 %v108_v30, %v916_v54  ;;  %v435_v4 = vand.u32 4294901760, %v938_v7 }
  0x94   :  { %v35_v34 = vpop.permute.xlu1 %34  ;;  %v33_v37 = vpop.permute.xlu0 %32  ;;  %248 = vmatpush.msra.mxu2 %v865_v17  ;;  %144 = vmatpush.msra.mxu0 %v854_v11  ;;  %v197_v38 = vand.u32 4294901760, %v865_v17  ;;  %v203_v45 = vand.u32 4294901760, %v875_v28 }
  0x95   :  { %v38_v44 = vsel %vm36_vm6, %v35_v34, %v33_v37  ;;  %194 = vmatpush.msra.mxu1 %v193_v16  ;;  %284 = vmatpush.msra.mxu3 %v854_v11  ;;  %v37_v61 = vsel %vm36_vm6, %v33_v37, %v35_v34  ;;  %v951_v16 = vand.u32 4294901760, %v106_v56  ;;  %v429_v37 = vand.u32 4294901760, %v919_v55 }
  0x96   :  { %v101_v24 = vmul.f32 %v83_v21, %v38_v44  ;;  %251 = vmatpush.msra.mxu2 %v875_v28  ;;  %v198_v50 = vsub.f32 %v865_v17, %v197_v38  ;;  %v204_v48 = vsub.f32 %v875_v28, %v203_v45  ;;  %v102_v21 = vmul.f32 %v84_v62, %v37_v61 }
  0x97   :  { %v418_v44 = vsub.f32 %v884_v39, %v417_v2  ;;  %v976_v61 = vsub.f32 %v106_v56, %v951_v16 }
  0x98   :  { %v921_v58 = vand.u32 4294901760, %v101_v24  ;;  %v199_v59 = vand.u32 4294901760, %v198_v50  ;;  %v205_v63 = vand.u32 4294901760, %v204_v48  ;;  %v152_v50 = vsub.f32 %v906_v51, %v935_v6 }
  0x99   :  { %v424_v48 = vsub.f32 %v909_v52, %v423_v12  ;;  %v978_v62 = vand.u32 4294901760, %v102_v21 }
  0x9a   :  { %146 = vmatpush.msra.mxu0 %v921_v58  ;;  %200 = vmatpush.msra.mxu1 %v199_v59  ;;  %v932_v5 = vsub.f32 %v101_v24, %v921_v58  ;;  %v441_v59 = vand.u32 4294901760, %v949_v15 }
  0x9b   :  { %286 = vmatpush.msra.mxu3 %v921_v58 }
  0x9c   :  { %v26_v20 = vpop.permute.xlu0 %25  ;;  %206 = vmatpush.msra.mxu1 %v205_v63  ;;  %254 = vmatpush.msra.mxu2 %v932_v5  ;;  %v209_v34 = vand.u32 4294901760, %v932_v5 }
  0x9d   :  { %v30_v42 = vsel %vm29_vm7, %v24_v3, %v26_v20  ;;  %v31_v30 = vsel %vm29_vm7, %v26_v20, %v24_v3  ;;  %v986_v20 = vsub.f32 %v104_v60, %v956_v41  ;;  %v442_v60 = vsub.f32 %v949_v15, %v441_v59 }
  0x9e   :  { %v99_v46 = vmul.f32 %v81_v8, %v31_v30  ;;  %v100_v49 = vmul.f32 %v82_v9, %v30_v42  ;;  %v210_v24 = vsub.f32 %v932_v5, %v209_v34  ;;  %v419_v8 = vand.u32 4294901760, %v418_v44 }
  0x9f   :  { %v430_v9 = vsub.f32 %v919_v55, %v429_v37  ;;  %v992_v30 = vand.u32 4294901760, %v152_v50  ;;  %v425_v44 = vand.u32 4294901760, %v424_v48  ;;  %v453_v48 = vand.u32 4294901760, %v986_v20 }
  0xa0   :  { %v980_v63 = vand.u32 4294901760, %v99_v46  ;;  %v211_v3 = vand.u32 4294901760, %v210_v24  ;;  %v988_v42 = vand.u32 4294901760, %v100_v49  ;;  %v1001_v24 = vsub.f32 %v102_v21, %v978_v62 }
  0xa1   :  { %v454_v25 = vsub.f32 %v986_v20, %v453_v48 }
  0xa2   :  { %148 = vmatpush.msra.mxu0 %v980_v63  ;;  %212 = vmatpush.msra.mxu1 %v211_v3  ;;  %v214_v56 = vsub.f32 %v99_v46, %v980_v63  ;;  %v436_v46 = vsub.f32 %v938_v7, %v435_v4  ;;  %v447_v3 = vand.u32 4294901760, %v976_v61  ;;  %v1011_v27 = vsub.f32 %v100_v49, %v988_v42 }
  0xa3   :  { %288 = vmatpush.msra.mxu3 %v980_v63  ;;  %154 = vmatmul.f32.vlgmr.msra.gmra.mxu0 %v992_v30  ;;  %v455_v36 = vand.u32 4294901760, %v454_v25 }
  0xa4   :  { %306 = vmatpush.msrb.mxu0 %v167_v32  ;;  %257 = vmatpush.msra.mxu2 %v214_v56  ;;  %v215_v50 = vand.u32 4294901760, %v214_v56  ;;  %v431_v32 = vand.u32 4294901760, %v430_v9  ;;  %v437_v29 = vand.u32 4294901760, %v436_v46  ;;  %v448_v49 = vsub.f32 %v976_v61, %v447_v3 }
  0xa5   :  { %420 = vmatpush.msrb.mxu3 %v419_v8  ;;  %v443_v8 = vand.u32 4294901760, %v442_v60  ;;  %v459_v9 = vand.u32 4294901760, %v1001_v24  ;;  %260 = vmatmul.f32.vlgmr.msra.gmra.mxu2 %v906_v51 }
  0xa6   :  { %310 = vmatpush.msrb.mxu0 %v173_v35  ;;  %382 = vmatpush.msrb.mxu2 %v859_v13  ;;  %v216_v21 = vsub.f32 %v214_v56, %v215_v50  ;;  %v449_v47 = vand.u32 4294901760, %v448_v49 }
  0xa7   :  { %426 = vmatpush.msrb.mxu3 %v425_v44 }
  0xa8   :  { %314 = vmatpush.msrb.mxu0 %v179_v33  ;;  %384 = vmatpush.msrb.mxu2 %v869_v19  ;;  %v217_v35 = vand.u32 4294901760, %v216_v21  ;;  %v465_v33 = vand.u32 4294901760, %v1011_v27 }
  0xa9   :  { %432 = vmatpush.msrb.mxu3 %v431_v32 }
  0xaa   :  { %318 = vmatpush.msrb.mxu0 %v185_v57  ;;  %386 = vmatpush.msrb.mxu2 %v878_v31  ;;  %v460_v57 = vsub.f32 %v1001_v24, %v459_v9 }
  0xab   :  { %438 = vmatpush.msrb.mxu3 %v437_v29  ;;  %218 = vmatpush.msra.mxu1 %v217_v35 }
  0xac   :  { %322 = vmatpush.msrb.mxu0 %v191_v43  ;;  %388 = vmatpush.msrb.mxu2 %v911_v53  ;;  %v461_v43 = vand.u32 4294901760, %v460_v57 }
  0xad   :  { %352 = vmatpush.msrb.mxu1 %v749_v23  ;;  %444 = vmatpush.msrb.mxu3 %v443_v8  ;;  %v466_v23 = vsub.f32 %v1011_v27, %v465_v33 }
  0xae   :  { %326 = vmatpush.msrb.mxu0 %v197_v38  ;;  %390 = vmatpush.msrb.mxu2 %v916_v54 }
  0xaf   :  { %354 = vmatpush.msrb.mxu1 %v747_v22  ;;  %450 = vmatpush.msrb.mxu3 %v449_v47  ;;  %v467_v22 = vand.u32 4294901760, %v466_v23 }
  0xb0   :  { %330 = vmatpush.msrb.mxu0 %v203_v45  ;;  %392 = vmatpush.msrb.mxu2 %v951_v16 }
  0xb1   :  { %356 = vmatpush.msrb.mxu1 %v739_v14  ;;  %456 = vmatpush.msrb.mxu3 %v455_v36  ;;  %v655_v14 = vmov 0  }
  0xb2   :  { %334 = vmatpush.msrb.mxu0 %v209_v34  ;;  %394 = vmatpush.msrb.mxu2 %v956_v41 }
  0xb3   :  { %358 = vmatpush.msrb.mxu1 %v790_v40  ;;  %462 = vmatpush.msrb.mxu3 %v461_v43 }
  0xb4   :  { %338 = vmatpush.msrb.mxu0 %v215_v50  ;;  %396 = vmatpush.msrb.mxu2 %v978_v62 }
  0xb5   :  { %360 = vmatpush.msrb.mxu1 %v756_v26  ;;  %468 = vmatpush.msrb.mxu3 %v467_v22  ;;  %v118_v26 = vld [vmem:[%s1131_s1] sm:$0xff] }
  0xb6   :  { %292 = vmatmul.f32.vlgmr.msra.gmra.mxu3 %v935_v6  ;;  %483 = vmatpush.msra.mxu0 %v884_v39 }
  0xb7   :  { %602 = vmatpush.msra.mxu3 %v859_v13  ;;  %362 = vmatpush.msrb.mxu1 %v852_v10 }
  0xb8   :  { %398 = vmatpush.msrb.mxu2 %v988_v42  ;;  %486 = vmatpush.msra.mxu0 %v909_v52 }
  0xb9   :  { %604 = vmatpush.msra.mxu3 %v869_v19  ;;  %364 = vmatpush.msrb.mxu1 %v854_v11 }
  0xba   :  { %556 = vmatpush.msra.mxu2 %v417_v2  ;;  %489 = vmatpush.msra.mxu0 %v919_v55 }
  0xbb   :  { %606 = vmatpush.msra.mxu3 %v878_v31  ;;  %366 = vmatpush.msrb.mxu1 %v921_v58 }
  0xbc   :  { %560 = vmatpush.msra.mxu2 %v423_v12  ;;  %492 = vmatpush.msra.mxu0 %v938_v7 }
  0xbd   :  { %608 = vmatpush.msra.mxu3 %v911_v53  ;;  %368 = vmatpush.msrb.mxu1 %v980_v63 }
  0xbe   :  { %564 = vmatpush.msra.mxu2 %v429_v37  ;;  %495 = vmatpush.msra.mxu0 %v949_v15 }
  0xbf   :  { %220 = vmatmul.f32.vlgmr.msra.gmra.mxu1 %v867_v18  ;;  %610 = vmatpush.msra.mxu3 %v916_v54 }
  0xc0   :  { %568 = vmatpush.msra.mxu2 %v435_v4  ;;  %522 = vmatpush.msra.mxu1 %v859_v13 }
  0xc1   :  { %498 = vmatpush.msra.mxu0 %v976_v61  ;;  %612 = vmatpush.msra.mxu3 %v951_v16 }
  0xc2   :  { %572 = vmatpush.msra.mxu2 %v441_v59  ;;  %524 = vmatpush.msra.mxu1 %v869_v19 }
  0xc3   :  { %501 = vmatpush.msra.mxu0 %v986_v20  ;;  %614 = vmatpush.msra.mxu3 %v956_v41 }
  0xc4   :  { %576 = vmatpush.msra.mxu2 %v447_v3  ;;  %526 = vmatpush.msra.mxu1 %v878_v31 }
  0xc5   :  { %404 = vmatmul.f32.vlgmr.msrb.gmra.mxu2 %v992_v30  ;;  %340 = vmatmul.f32.vlgmr.msrb.gmra.mxu0 %v867_v18 }
  0xc6   :  { %504 = vmatpush.msra.mxu0 %v1001_v24  ;;  %528 = vmatpush.msra.mxu1 %v911_v53 }
  0xc7   :  { %580 = vmatpush.msra.mxu2 %v453_v48  ;;  %616 = vmatpush.msra.mxu3 %v978_v62 }
  0xc8   :  { %470 = vmatmul.f32.vlgmr.msrb.gmra.mxu3 %v867_v18  ;;  %645 = vset.pattern.permute.xlu1 %v655_v14 }
  0xc9   :  { %370 = vmatmul.f32.vlgmr.msrb.gmra.mxu1 %v867_v18  ;;  %507 = vmatpush.msra.mxu0 %v1011_v27 }
  0xca   :  { %530 = vmatpush.msra.mxu1 %v916_v54  ;;  %584 = vmatpush.msra.mxu2 %v459_v9 }
  0xcb   :  { %618 = vmatpush.msra.mxu3 %v988_v42  ;;  %121 = vperm.xlu1 %645, %v118_v26  }
  0xcc   :  { %532 = vmatpush.msra.mxu1 %v951_v16  ;;  %588 = vmatpush.msra.mxu2 %v465_v33 }
  0xcd   :  { %590 = vmatmul.f32.vlgmr.msra.gmra.mxu2 %v867_v18  ;;  %510 = vmatmul.f32.vlgmr.msra.gmra.mxu0 %v906_v51 }
  0xce   :  { %534 = vmatpush.msra.mxu1 %v956_v41  ;;  %646 = vset.pattern.permute.xlu0 %v655_v14 }
  0xd0   :  { %536 = vmatpush.msra.mxu1 %v978_v62  ;;  %620 = vmatmul.f32.vlgmr.msra.gmra.mxu3 %v867_v18  ;;  %v625_v18 = vstv %s1132_s2 }
  0xd2   :  { %538 = vmatpush.msra.mxu1 %v988_v42 }
  0xd3   :  { %542 = vmatmul.f32.vlgmr.msra.gmra.mxu1 %v935_v6 }
 0x120   :  { %v155_v40 = vpop.f32.mrf.mxu0 }
 0x128   :  { %v261_v17 = vpop.f32.mrf.mxu2 }
 0x139   :  { %v293_v28 = vpop.f32.mrf.mxu3 }
 0x13c   :  { %v221_v10 = vpop.f32.mrf.mxu1 }
 0x13d   :  { %v122_v11 = vpop.permute.xlu1 %121 }
 0x13e   :  { %v156_v13 = vadd.f32 %v155_v40, %v122_v11 }
 0x140   :  { %v222_v19 = vadd.f32 %v221_v10, %v156_v13 }
 0x142   :  { %v262_v31 = vadd.f32 %v261_v17, %v222_v19  ;;  %v341_v38 = vpop.f32.mrf.mxu0 }
 0x144   :  { %v294_v39 = vadd.f32 %v293_v28, %v262_v31 }
 0x146   :  { %v342_v45 = vadd.f32 %v341_v38, %v294_v39  ;;  %v371_v51 = vpop.f32.mrf.mxu1 }
 0x148   :  { %v372_v52 = vadd.f32 %v371_v51, %v342_v45  ;;  %v405_v53 = vpop.f32.mrf.mxu2 }
 0x149   :  { %v406_v54 = vadd.f32 %v405_v53, %v122_v11 }
 0x14a   :  { %v626_v55 = vmul.f32 %v625_v18, %v372_v52  ;;  %v511_v2 = vpop.f32.mrf.mxu0 }
 0x14b   :  { %v471_v58 = vpop.f32.mrf.mxu3 }
 0x14c   :  { %v628_v5 = vadd.f32 %v626_v55, %v689_v0  ;;  %v472_v6 = vadd.f32 %v471_v58, %v406_v54 }
 0x14e   :  { %630 = vst [vmem:[%s1133_s5] sm:$0xff] %v628_v5  ;;  %v512_v7 = vadd.f32 %v511_v2, %v472_v6 }
 0x150   :  { %v543_v12 = vpop.f32.mrf.mxu1  ;;  %v591_v15 = vpop.f32.mrf.mxu2 }
 0x151   :  { %v544_v16 = vadd.f32 %v543_v12, %v512_v7 }
 0x153   :  { %v592_v34 = vadd.f32 %v591_v15, %v544_v16  ;;  %v621_v37 = vpop.f32.mrf.mxu3 }
 0x155   :  { %v622_v41 = vadd.f32 %v621_v37, %v592_v34 }
 0x157   :  { %v627_v4 = vmul.f32 %v625_v18, %v622_v41 }
 0x159   :  { %v629_v59 = vadd.f32 %v627_v4, %v697_v1 }
 0x15b   :  { %631 = vst [vmem:[%s1133_s5 + $0x8] sm:$0xff] %v629_v59 }

</bundles_post_ra>
